<compile_context>
chip_gen: v5e
topology: v5e:2x2
jax: 0.10.0
libtpu: 0.0.40
codegen_flags: <defaults>
</compile_context>

<pallas_src>
import jax
import jax.numpy as jnp
from jax import lax
from jax.experimental import pallas as pl
from jax.experimental.pallas import tpu as pltpu


# ---------------------------------------------------------------------------
# helpers
# ---------------------------------------------------------------------------
def _softmax_last(x):
    m = jnp.max(x, axis=-1, keepdims=True)
    e = jnp.exp(x - m)
    return e / jnp.sum(e, axis=-1, keepdims=True)


def _vmem_limit_bytes():
    """Generation-aware VMEM cap (v5e/v6e: 128 MiB physical, v7x: 64 MiB)."""
    try:
        cap = int(pltpu.get_tpu_info().vmem_capacity_bytes)
    except Exception:
        try:
            kind = jax.devices()[0].device_kind.lower()
            cap = 64 * 2**20 if "7" in kind else 128 * 2**20
        except Exception:
            cap = 64 * 2**20
    return max(min(cap - 8 * 2**20, 100 * 2**20), 32 * 2**20)


# ---------------------------------------------------------------------------
# Kernel 1a: edge gather  neigh[e] = entity_emb[tail[e]] * relation_emb[etype[e]]
# ---------------------------------------------------------------------------
def _gather_neigh_resident_kernel(tail_smem,   # [E]        int32  (SMEM prefetch)
                                  etype_ref,   # [1, TE]    int32
                                  ent_ref,     # [N_ent, D] f32   (VMEM resident)
                                  rel_ref,     # [n_rel, D] f32
                                  out_ref):    # [TE, D]    f32
    te, _ = out_ref.shape
    base = pl.program_id(0) * te

    # Relation rows via a tiny one-hot matmul (n_rel is small).
    n_rel = rel_ref.shape[0]
    etype = etype_ref[...]                                        # [1, TE]
    rel_iota = lax.broadcasted_iota(jnp.int32, (n_rel, te), 0)
    onehot_r = (rel_iota == etype).astype(jnp.float32)            # [n_rel, TE]
    r_edge = lax.dot_general(onehot_r, rel_ref[...],
                             (((0,), (0,)), ((), ())),
                             preferred_element_type=jnp.float32)  # [TE, D]

    # Dynamic row loads from the VMEM-resident entity table (one vld per edge,
    # no DMA descriptors).  Padded edges (tail==0) are harmless: their head is
    # a sentinel that never matches in kernel 1b.
    @pl.loop(0, te)
    def _gather(e):
        idx = tail_smem[base + e]
        out_ref[pl.ds(e, 1), :] = ent_ref[pl.ds(idx, 1), :]

    out_ref[...] = out_ref[...] * r_edge


def _gather_neigh_dma_kernel(tail_smem,    # [E]        int32  (SMEM prefetch)
                             etype_ref,    # [1, TE]    int32
                             ent_hbm,      # [N_ent, D] f32    (HBM, pl.ANY)
                             rel_ref,      # [n_rel, D] f32
                             out_ref,      # [TE, D]    f32
                             tbuf,         # [TE, D]    f32 scratch
                             sem):         # DMA semaphore
    te, _ = out_ref.shape
    base = pl.program_id(0) * te

    # Issue one row DMA per edge: entity_emb[tail[e]] -> tbuf[e].
    @pl.loop(0, te)
    def _issue(e):
        idx = tail_smem[base + e]
        pltpu.make_async_copy(ent_hbm.at[pl.ds(idx, 1)],
                              tbuf.at[pl.ds(e, 1)], sem).start()

    # Relation rows while the gather DMAs are in flight.
    n_rel = rel_ref.shape[0]
    etype = etype_ref[...]                                        # [1, TE]
    rel_iota = lax.broadcasted_iota(jnp.int32, (n_rel, te), 0)
    onehot_r = (rel_iota == etype).astype(jnp.float32)
    r_edge = lax.dot_general(onehot_r, rel_ref[...],
                             (((0,), (0,)), ((), ())),
                             preferred_element_type=jnp.float32)  # [TE, D]

    # Waits: fixed HBM source row (only the byte count matters); the dst slice
    # carries the dependency on each tbuf row.  No SMEM index re-read here.
    @pl.loop(0, te)
    def _wait(e):
        pltpu.make_async_copy(ent_hbm.at[pl.ds(0, 1)],
                              tbuf.at[pl.ds(e, 1)], sem).wait()

    out_ref[...] = tbuf[...] * r_edge


# ---------------------------------------------------------------------------
# Kernel 1b: scatter_mean by head (head-sorted edges, prefetched tile ranges)
# ---------------------------------------------------------------------------
def _segment_mean_kernel(tile_start_ref,   # [n_entity_tiles] int32 (SMEM prefetch)
                         num_ref,          # [n_entity_tiles] int32 (SMEM prefetch)
                         head_ref,         # [1, TE]  int32
                         neigh_ref,        # [TE, D]  f32
                         out_ref,          # [TN, D]  f32  (resident accumulator)
                         cnt_ref):         # [TN, 1]  f32 scratch
    i = pl.program_id(0)
    k = pl.program_id(1)
    tn, _ = out_ref.shape
    te = neigh_ref.shape[0]

    @pl.when(k == 0)
    def _():
        out_ref[...] = jnp.zeros_like(out_ref)
        cnt_ref[...] = jnp.zeros_like(cnt_ref)

    # Only the edge tiles that actually contain this entity tile's heads.
    @pl.when(k < num_ref[i])
    def _():
        head = head_ref[...]                                          # [1, TE]
        row_ids = lax.broadcasted_iota(jnp.int32, (tn, te), 0) + i * tn
        onehot = (row_ids == head).astype(jnp.float32)                # [TN, TE]
        # segment sum on the MXU (K = TE contraction)
        out_ref[...] += jnp.dot(onehot, neigh_ref[...],
                                preferred_element_type=jnp.float32)
        # per-head edge counts: XLU lane reduction
        cnt_ref[...] += jnp.sum(onehot, axis=1, keepdims=True)

    @pl.when(k == pl.num_programs(1) - 1)
    def _():
        # scatter_mean semantics: empty segments -> 0
        out_ref[...] = out_ref[...] / jnp.maximum(cnt_ref[...], 1.0)


# ---------------------------------------------------------------------------
# Kernel 2: user aggregation (intent attention + class attention, fused)
# ---------------------------------------------------------------------------
def _user_agg_kernel(user_ref,       # [TU, D]            f32
                     cls_ref,        # [n_cls, D]          f32
                     latent_ref,     # [n_factors, D]      f32
                     disenw_ref,     # [n_factors, D]      f32 (softmax(disen)@rel)
                     item_ref,       # [TI, D]             f32
                     inter_ref,      # [TU, TI]            int8 / f32
                     inter_cls_ref,  # [n_cls, TU, TI]     int8 / f32
                     out_ref,        # [TU, D]             f32 (resident accumulator)
                     att_ref):       # [TU, n_cls]         f32 scratch
    k = pl.program_id(1)

    # Grid-invariant (per user tile) attention terms: compute once at k == 0,
    # initializing the resident output block with the intent term.
    @pl.when(k == 0)
    def _():
        user = user_ref[...]                                       # [TU, D]
        score = _softmax_last(lax.dot_general(
            user, latent_ref[...], (((1,), (1,)), ((), ())),
            preferred_element_type=jnp.float32))                   # [TU, F]
        out_ref[...] = jnp.dot(score, disenw_ref[...],
                               preferred_element_type=jnp.float32)
        att_ref[...] = _softmax_last(lax.dot_general(
            user, cls_ref[...], (((1,), (1,)), ((), ())),
            preferred_element_type=jnp.float32))                   # [TU, C]

    # Fold interact + class-weighted matrices into one effective matrix
    # (n_cls cheap VPU FMAs) and run a single MXU matmul per (user, item) tile.
    att = att_ref[...]
    n_cls = inter_cls_ref.shape[0]
    m = inter_ref[...].astype(jnp.float32)                         # [TU, TI]
    for c in range(n_cls):                                         # small static loop
        m = m + att[:, c:c + 1] * inter_cls_ref[c].astype(jnp.float32)
    # TODO(synk): one-line throughput switch (2-3x matmul on all gens, ~1e-3 err):
    #   out_ref[...] += jnp.dot(m.astype(jnp.bfloat16),
    #                           item_ref[...].astype(jnp.bfloat16),
    #                           preferred_element_type=jnp.float32)
    out_ref[...] += jnp.dot(m, item_ref[...],
                            preferred_element_type=jnp.float32)


# ---------------------------------------------------------------------------
# Wrapper
# ---------------------------------------------------------------------------
def cls_aggregator(entity_emb, item_emb, user_emb, cls_emb, relation_emb,
                   latent_emb, edge_index, edge_type, interact_mat,
                   inter_cls_mat, disen_weight_att,
                   *, edge_tile=512, entity_tile=256,
                   user_tile=256, item_tile=256,
                   entity_table_resident=None):
    # NOTE: grid sizing for kernel 1b is value-dependent (edge ranges per
    # entity tile), so this wrapper must be called eagerly (outside jit); the
    # pallas_calls themselves are compiled as usual.
    f32 = jnp.float32
    entity_emb = entity_emb.astype(f32)
    item_emb = item_emb.astype(f32)
    user_emb = user_emb.astype(f32)
    cls_emb = cls_emb.astype(f32)
    relation_emb = relation_emb.astype(f32)
    latent_emb = latent_emb.astype(f32)
    disen_weight_att = disen_weight_att.astype(f32)

    n_entities, emb_d = entity_emb.shape
    n_items = item_emb.shape[0]
    n_users = user_emb.shape[0]
    n_cls = cls_emb.shape[0]
    n_rel = relation_emb.shape[0]
    n_factors = latent_emb.shape[0]

    entity_tile = min(entity_tile, n_entities)
    user_tile = min(user_tile, n_users)
    item_tile = min(item_tile, n_items)
    assert n_entities % entity_tile == 0
    assert n_users % user_tile == 0
    assert n_items % item_tile == 0
    # v5e: prefer 128-row M/N tiles (native 128x128 MXUs); keep the deep K
    # dims (edge_tile, item_tile) at 256-512 on every generation.

    vmem_limit = _vmem_limit_bytes()

    # -------- edges: sort by head so each entity tile streams only its edges
    head = edge_index[0].astype(jnp.int32)
    tail = edge_index[1].astype(jnp.int32)
    etype = edge_type.astype(jnp.int32)
    order = jnp.argsort(head)
    head, tail, etype = head[order], tail[order], etype[order]
    n_edges = int(head.shape[0])
    e_pad = pl.cdiv(n_edges, edge_tile) * edge_tile
    if e_pad != n_edges:
        pad = e_pad - n_edges
        # sentinel head == n_entities keeps the array sorted and never matches
        # a real entity row in kernel 1b; padded tails/etypes gather row 0
        # (harmless wasted work, last tile only).
        head = jnp.concatenate([head, jnp.full((pad,), n_entities, jnp.int32)])
        tail = jnp.concatenate([tail, jnp.zeros((pad,), jnp.int32)])
        etype = jnp.concatenate([etype, jnp.zeros((pad,), jnp.int32)])
    head_row = head[None, :]      # [1, E] lane-major
    etype_row = etype[None, :]

    n_edge_tiles = e_pad // edge_tile
    n_entity_tiles = n_entities // entity_tile
    n_user_tiles = n_users // user_tile
    n_item_tiles = n_items // item_tile

    # per-entity-tile edge-tile ranges (scalar-prefetched into SMEM)
    bounds = jnp.arange(n_entity_tiles + 1, dtype=jnp.int32) * entity_tile
    edge_bounds = jnp.searchsorted(head, bounds).astype(jnp.int32)
    start_e, end_e = edge_bounds[:-1], edge_bounds[1:]
    tile_start = (start_e // edge_tile).astype(jnp.int32)
    num_tiles = jnp.where(end_e > start_e,
                          (end_e - 1) // edge_tile - start_e // edge_tile + 1,
                          0).astype(jnp.int32)
    max_tiles = max(int(jnp.max(num_tiles)), 1)
    visited = max(int(jnp.sum(num_tiles)), 1)

    # ---------------- Kernel 1a: gather tail/relation rows ------------------
    ent_bytes = n_entities * emb_d * 4
    if entity_table_resident is None:
        entity_table_resident = ent_bytes <= vmem_limit // 4

    if entity_table_resident:
        gather_kernel = _gather_neigh_resident_kernel
        ent_spec = pl.BlockSpec((n_entities, emb_d), lambda k, tail_s: (0, 0))
        gather_scratch = []
    else:
        gather_kernel = _gather_neigh_dma_kernel
        ent_spec = pl.BlockSpec(memory_space=pl.ANY)      # entity table in HBM
        gather_scratch = [pltpu.VMEM((edge_tile, emb_d), f32),
                          pltpu.SemaphoreType.DMA]

    neigh = pl.pallas_call(
        gather_kernel,
        out_shape=jax.ShapeDtypeStruct((e_pad, emb_d), f32),
        grid_spec=pltpu.PrefetchScalarGridSpec(
            num_scalar_prefetch=1,
            grid=(n_edge_tiles,),
            in_specs=[
                pl.BlockSpec((1, edge_tile), lambda k, tail_s: (0, k)),
                ent_spec,
                pl.BlockSpec((n_rel, emb_d), lambda k, tail_s: (0, 0)),
            ],
            out_specs=pl.BlockSpec((edge_tile, emb_d), lambda k, tail_s: (k, 0)),
            scratch_shapes=gather_scratch,
        ),
        compiler_params=pltpu.CompilerParams(
            dimension_semantics=("parallel",),
            vmem_limit_bytes=vmem_limit),
        cost_estimate=pl.CostEstimate(
            flops=int(2 * e_pad * n_rel * emb_d + e_pad * emb_d),
            transcendentals=0,
            bytes_accessed=int(4 * (2 * e_pad * emb_d + n_entities * emb_d)
                               + 8 * e_pad)),
    )(tail, etype_row, entity_emb, relation_emb)

    # ---------------- Kernel 1b: scatter_mean by head -----------------------
    def _edge_block(i, k, ts, num):
        t = ts[i] + jnp.minimum(k, jnp.maximum(num[i] - 1, 0))
        return jnp.minimum(t, n_edge_tiles - 1)

    entity_agg = pl.pallas_call(
        _segment_mean_kernel,
        out_shape=jax.ShapeDtypeStruct((n_entities, emb_d), f32),
        grid_spec=pltpu.PrefetchScalarGridSpec(
            num_scalar_prefetch=2,
            grid=(n_entity_tiles, max_tiles),
            in_specs=[
                pl.BlockSpec((1, edge_tile),
                             lambda i, k, ts, num: (0, _edge_block(i, k, ts, num))),
                pl.BlockSpec((edge_tile, emb_d),
                             lambda i, k, ts, num: (_edge_block(i, k, ts, num), 0)),
            ],
            out_specs=pl.BlockSpec((entity_tile, emb_d),
                                   lambda i, k, ts, num: (i, 0)),
            scratch_shapes=[pltpu.VMEM((entity_tile, 1), f32)],
        ),
        compiler_params=pltpu.CompilerParams(
            dimension_semantics=("parallel", "arbitrary"),
            vmem_limit_bytes=vmem_limit),
        cost_estimate=pl.CostEstimate(
            flops=int(2 * visited * edge_tile * entity_tile * emb_d),
            transcendentals=0,
            bytes_accessed=int(4 * (visited * edge_tile * emb_d
                                    + n_entities * emb_d
                                    + visited * edge_tile))),
    )(tile_start, num_tiles, head_row, neigh)

    # ---------------- Kernel 2: user aggregation ----------------------------
    # Grid-invariant disen weight hoisted to the wrapper (runs once).
    disen_w = jax.nn.softmax(disen_weight_att, axis=-1) @ relation_emb   # [F, D]

    def _compact01(x):
        # 0/1 structural matrices are exact in int8 (4x less HBM than f32).
        # TODO(synk): bit-pack 8 edges/byte for a further 8x if needed.
        if bool(jnp.all((x == 0) | (x == 1))):
            return x.astype(jnp.int8)
        return x.astype(f32)

    interact_s = _compact01(interact_mat)
    inter_cls_s = _compact01(inter_cls_mat)
    i_bytes = interact_s.dtype.itemsize

    user_agg = pl.pallas_call(
        _user_agg_kernel,
        out_shape=jax.ShapeDtypeStruct((n_users, emb_d), f32),
        grid_spec=pltpu.PrefetchScalarGridSpec(
            num_scalar_prefetch=0,
            grid=(n_user_tiles, n_item_tiles),
            in_specs=[
                pl.BlockSpec((user_tile, emb_d), lambda i, k: (i, 0)),       # user
                pl.BlockSpec((n_cls, emb_d), lambda i, k: (0, 0)),           # cls
                pl.BlockSpec((n_factors, emb_d), lambda i, k: (0, 0)),       # latent
                pl.BlockSpec((n_factors, emb_d), lambda i, k: (0, 0)),       # disen_w
                pl.BlockSpec((item_tile, emb_d), lambda i, k: (k, 0)),       # item
                pl.BlockSpec((user_tile, item_tile), lambda i, k: (i, k)),   # interact
                pl.BlockSpec((n_cls, user_tile, item_tile),
                             lambda i, k: (0, i, k)),                        # inter_cls
            ],
            out_specs=pl.BlockSpec((user_tile, emb_d), lambda i, k: (i, 0)),
            scratch_shapes=[pltpu.VMEM((user_tile, n_cls), f32)],
        ),
        compiler_params=pltpu.CompilerParams(
            dimension_semantics=("parallel", "arbitrary"),
            vmem_limit_bytes=vmem_limit),
        cost_estimate=pl.CostEstimate(
            flops=int(2 * n_users * n_items * emb_d
                      + 2 * n_cls * n_users * n_items
                      + 2 * n_users * (n_factors + n_cls) * emb_d),
            transcendentals=int(n_users * (n_factors + n_cls)),
            bytes_accessed=int(i_bytes * (1 + n_cls) * n_users * n_items
                               + 4 * (2 * n_users * emb_d
                                      + n_user_tiles * n_items * emb_d))),
    )(user_emb, cls_emb, latent_emb, disen_w, item_emb, interact_s, inter_cls_s)

    return entity_agg, user_agg


# ---------------------------------------------------------------------------
# Pure-JAX reference (mirrors the PyTorch forward semantics)
# ---------------------------------------------------------------------------
def cls_aggregator_ref(entity_emb, item_emb, user_emb, cls_emb, relation_emb,
                       latent_emb, edge_index, edge_type, interact_mat,
                       inter_cls_mat, disen_weight_att):
    n_entities, emb_d = entity_emb.shape
    head, tail = edge_index[0], edge_index[1]
    neigh = entity_emb[tail] * relation_emb[edge_type]
    sums = jnp.zeros((n_entities, emb_d), jnp.float32).at[head].add(neigh)
    counts = jnp.zeros((n_entities,), jnp.float32).at[head].add(1.0)
    entity_agg = sums / jnp.maximum(counts, 1.0)[:, None]

    user_agg = interact_mat @ item_emb
    user_disen_att = jax.nn.softmax(user_emb @ latent_emb.T, axis=1)
    disen_weight = jax.nn.softmax(disen_weight_att, axis=-1) @ relation_emb
    user_agg = user_disen_att @ disen_weight + user_agg

    user_cls_att = jax.nn.softmax(user_emb @ cls_emb.T, axis=1)
    user_cls_ = jnp.einsum('cui,id->cud', inter_cls_mat, item_emb)   # [C, U, D]
    user_cls_ = jnp.transpose(user_cls_, (1, 0, 2))                  # [U, C, D]
    user_agg = jnp.sum(user_cls_ * user_cls_att[..., None], axis=1) + user_agg
    return entity_agg, user_agg


# ---------------------------------------------------------------------------
if __name__ == "__main__":
    key = jax.random.PRNGKey(0)
    ks = jax.random.split(key, 12)

    # Small but multi-tile shapes; D = 128 keeps outputs lane-dense and >=2
    # tiles exist on every 'parallel' grid axis (feeds both v7x TensorCores).
    n_entities, n_items, n_users = 512, 512, 512
    n_cls, n_relations, n_factors = 4, 8, 4
    emb_d, n_edges = 128, 2000           # 2000 exercises edge-tile padding

    entity_emb = jax.random.normal(ks[0], (n_entities, emb_d), jnp.float32)
    item_emb = jax.random.normal(ks[1], (n_items, emb_d), jnp.float32)
    user_emb = jax.random.normal(ks[2], (n_users, emb_d), jnp.float32)
    cls_emb = jax.random.normal(ks[3], (n_cls, emb_d), jnp.float32)
    relation_emb = jax.random.normal(ks[4], (n_relations, emb_d), jnp.float32)
    latent_emb = jax.random.normal(ks[5], (n_factors, emb_d), jnp.float32)
    disen_weight_att = jax.random.normal(ks[6], (n_factors, n_relations), jnp.float32)

    head = jax.random.randint(ks[7], (n_edges,), 0, n_entities, jnp.int32)
    tail = jax.random.randint(ks[8], (n_edges,), 0, n_entities, jnp.int32)
    edge_index = jnp.stack([head, tail], axis=0)                     # [2, E]
    edge_type = jax.random.randint(ks[9], (n_edges,), 0, n_relations, jnp.int32)

    # TODO(synk): torch.sparse.mm is realized with dense 0/1 interaction
    # matrices (no sparse-matmul primitive in Pallas); stored as int8 in HBM
    # and streamed as tiles inside kernel 2.
    interact_mat = (jax.random.uniform(ks[10], (n_users, n_items)) < 0.1
                    ).astype(jnp.float32)
    inter_cls_mat = (jax.random.uniform(ks[11], (n_cls, n_users, n_items)) < 0.1
                     ).astype(jnp.float32)

    entity_agg, user_agg = cls_aggregator(
        entity_emb, item_emb, user_emb, cls_emb, relation_emb, latent_emb,
        edge_index, edge_type, interact_mat, inter_cls_mat, disen_weight_att)
    jax.block_until_ready((entity_agg, user_agg))

    ref_ent, ref_usr = cls_aggregator_ref(
        entity_emb, item_emb, user_emb, cls_emb, relation_emb, latent_emb,
        edge_index, edge_type, interact_mat, inter_cls_mat, disen_weight_att)

    assert jnp.allclose(entity_agg, ref_ent, atol=1e-3, rtol=1e-3), \
        float(jnp.max(jnp.abs(entity_agg - ref_ent)))
    assert jnp.allclose(user_agg, ref_usr, atol=1e-3, rtol=1e-3), \
        float(jnp.max(jnp.abs(user_agg - ref_usr)))
    print("KERNEL_OK")
</pallas_src>

<mosaic_0001>
module attributes {stable_mosaic.version = 11 : i64} {
  func.func @_gather_neigh_resident_kernel(%arg0: i32, %arg1: memref<2048xi32, #tpu.memory_space<smem>>, %arg2: memref<1x512xi32, #tpu.memory_space<vmem>>, %arg3: memref<512x128xf32, #tpu.memory_space<vmem>>, %arg4: memref<8x128xf32, #tpu.memory_space<vmem>>, %arg5: memref<512x128xf32, #tpu.memory_space<vmem>>) attributes {dimension_semantics = [#tpu.dimension_semantics<parallel>], iteration_bounds = array<i64: 4>, scalar_prefetch = 1 : i64, scratch_operands = 0 : i64, tpu.core_type = #tpu.core_type<tc>, window_params = [{transform_indices = @transform_0, window_bounds = array<i64: 1, 512>}, {pipeline_mode = #tpu.pipeline_mode<synchronous>, transform_indices = @transform_1, window_bounds = array<i64: 512, 128>}, {pipeline_mode = #tpu.pipeline_mode<synchronous>, transform_indices = @transform_2, window_bounds = array<i64: 8, 128>}, {transform_indices = @transform_3, window_bounds = array<i64: 512, 128>}]} {
    %c512_i32 = arith.constant 512 : i32
    %0 = arith.muli %arg0, %c512_i32 : i32
    %c0 = arith.constant 0 : index
    %c0_0 = arith.constant 0 : index
    %1 = vector.load %arg2[%c0, %c0_0] : memref<1x512xi32, #tpu.memory_space<vmem>>, vector<1x512xi32>
    %2 = tpu.iota {dimensions = array<i32: 0>} : vector<8x512xi32>
    %3 = vector.broadcast %1 : vector<1x512xi32> to vector<8x512xi32>
    %4 = arith.cmpi eq, %2, %3 : vector<8x512xi32>
    %5 = arith.extui %4 : vector<8x512xi1> to vector<8x512xi32>
    %6 = arith.sitofp %5 : vector<8x512xi32> to vector<8x512xf32>
    %c0_1 = arith.constant 0 : index
    %c0_2 = arith.constant 0 : index
    %7 = vector.load %arg4[%c0_1, %c0_2] : memref<8x128xf32, #tpu.memory_space<vmem>>, vector<8x128xf32>
    %cst = arith.constant dense<0.000000e+00> : vector<512x128xf32>
    %8 = tpu.matmul %6, %7, %cst {dimension_numbers = #tpu.dot_dimension_numbers<[0], [0], [1], [1], [0, 1, 1, 1], [], []>} : vector<8x512xf32>, vector<8x128xf32>, vector<512x128xf32> -> vector<512x128xf32>
    %c0_i32 = arith.constant 0 : i32
    %c512_i32_3 = arith.constant 512 : i32
    %9 = arith.addi %c0_i32, %c512_i32_3 : i32
    %c1_i32 = arith.constant 1 : i32
    scf.for %arg6 = %c0_i32 to %9 step %c1_i32  : i32 {
      %c1_i32_9 = arith.constant 1 : i32
      %13 = arith.muli %arg6, %c1_i32_9 : i32
      %c0_i32_10 = arith.constant 0 : i32
      %14 = arith.addi %c0_i32_10, %13 : i32
      %15 = arith.addi %0, %14 : i32
      %16 = arith.index_cast %15 : i32 to index
      %17 = memref.load %arg1[%16] : memref<2048xi32, #tpu.memory_space<smem>>
      %18 = arith.index_cast %17 : i32 to index
      %c0_11 = arith.constant 0 : index
      %19 = vector.load %arg3[%18, %c0_11] : memref<512x128xf32, #tpu.memory_space<vmem>>, vector<1x128xf32>
      %20 = arith.index_cast %14 : i32 to index
      %c0_12 = arith.constant 0 : index
      %21 = vector.load %arg5[%20, %c0_12] : memref<512x128xf32, #tpu.memory_space<vmem>>, vector<1x128xf32>
      tpu.vector_store %arg5[%20, %c0_12], %19 {strides = array<i32>} : memref<512x128xf32, #tpu.memory_space<vmem>>, vector<1x128xf32>,
    }
    %c512_i32_4 = arith.constant 512 : i32
    %c0_5 = arith.constant 0 : index
    %c0_6 = arith.constant 0 : index
    %10 = vector.load %arg5[%c0_5, %c0_6] : memref<512x128xf32, #tpu.memory_space<vmem>>, vector<512x128xf32>
    %11 = arith.mulf %10, %8 : vector<512x128xf32>
    %c0_7 = arith.constant 0 : index
    %c0_8 = arith.constant 0 : index
    %12 = vector.load %arg5[%c0_7, %c0_8] : memref<512x128xf32, #tpu.memory_space<vmem>>, vector<512x128xf32>
    tpu.vector_store %arg5[%c0_7, %c0_8], %11 {strides = array<i32>} : memref<512x128xf32, #tpu.memory_space<vmem>>, vector<512x128xf32>,
    return
  }
  func.func @transform_0(%arg0: i32, %arg1: memref<2048xi32, #tpu.memory_space<smem>>) -> (i32, i32) {
    %c0_i32 = arith.constant 0 : i32
    %c0_i32_0 = arith.constant 0 : i32
    return %c0_i32, %arg0 : i32, i32
  }
  func.func @transform_1(%arg0: i32, %arg1: memref<2048xi32, #tpu.memory_space<smem>>) -> (i32, i32) {
    %c0_i32 = arith.constant 0 : i32
    %c0_i32_0 = arith.constant 0 : i32
    %c0_i32_1 = arith.constant 0 : i32
    return %c0_i32, %c0_i32_0 : i32, i32
  }
  func.func @transform_2(%arg0: i32, %arg1: memref<2048xi32, #tpu.memory_space<smem>>) -> (i32, i32) {
    %c0_i32 = arith.constant 0 : i32
    %c0_i32_0 = arith.constant 0 : i32
    %c0_i32_1 = arith.constant 0 : i32
    return %c0_i32, %c0_i32_0 : i32, i32
  }
  func.func @transform_3(%arg0: i32, %arg1: memref<2048xi32, #tpu.memory_space<smem>>) -> (i32, i32) {
    %c0_i32 = arith.constant 0 : i32
    %c0_i32_0 = arith.constant 0 : i32
    return %arg0, %c0_i32 : i32, i32
  }
}

</mosaic_0001>

<bundles_post_ra>
// kernel: tpu_custom_call.1
= control target key start
LH: loop header
LB: loop body
LE: loop exit
PB: predicated region body
PF: predicated region fallthrough
CT: control target
= control target key end

     0   :  { %s1619_s18 = smov [#allocation3]   ;;  %s2145_s0 = inlined_call_operand.hbm [shape: s32[2048], index: 0, kind: input, shape index: {}]   ;;  %s2146_s1 = inlined_call_operand.hbm [shape: s32[1,2048], index: 1, kind: input, shape index: {}]   ;;  %s2147_s2 = inlined_call_operand.hbm [shape: f32[512,128], index: 2, kind: input, shape index: {}]   ;;  %s2148_s3 = inlined_call_operand.hbm [shape: f32[8,128], index: 3, kind: input, shape index: {}]   ;;  %s2149_s4 = inlined_call_operand.hbm [shape: f32[2048,128], index: 4, kind: output, shape index: {}]  }
   0x1   :  { %s10_s17 = sshll.u32 %s2145_s0, 4  ;;  %s11_s17 = int_to_ptr.hbm [resolvable:$true] %s10_s17 }
   0x2   :  { %13 = dma.hbm_to_smem %s11_s17, 256, %s1619_s18, [#allocation2] }
   0x3   :  { %1585 = dma.done.wait [#allocation2], 256 }
   0x4   :  { %1586 = vsyncadd [#allocation2], 4294967040 }
   0x5   :  { %16 = sfence }
   0x6   :  { %17 = vsyncpa [#allocation5], 0 }
   0x7   :  { %19 = vsyncpa [#allocation5 + $0x1], 0 }
   0x8   :  { %20 = vsyncpa [#allocation8], 0 }
   0x9   :  { %21 = vsyncpa [#allocation6], 0 }
   0xa   :  { %23 = vsyncpa [#allocation6 + $0x1], 0  ;;  %s1655_s19 = smov 0   ;;  %s1657_s20 = smov 0  }
   0xb   :  { %s1659_s21 = smov 0   ;;  %s1661_s22 = smov 0  }
   0xc LB: > { %s139_s24 = sshll.u32 %s2147_s2, 4  ;;  %s1679_s25 = sadd.s32 4294967295, %s1613_s22   ;;  %s1613_s22 = sphi %s1661_s22, %s2185_s22   ;;  %s1609_s21 = sphi %s1659_s21, %s2184_s21   ;;  %s1605_s20 = sphi %s1657_s20, %s2183_s20   ;;  %s1601_s19 = sphi %s1655_s19, %s2182_s19   ;;  %s140_s24 = int_to_ptr.hbm [resolvable:$true] %s139_s24 }
   0xd   : > { %p1101_p0 = scmp.ge.s32.totalorder %s1613_s22, 1  ;;  %p50_p1 = scmp.eq.s32.totalorder %s1679_s25, 0 }
   0xe   : > { %p128_p2 = scmp.lt.s32.totalorder %s1613_s22, 5  ;;  %s1620_s27 = smov [#allocation7]  }
   0xf   : > { %s141_s28 = sshll.u32 %s1620_s27, 4  ;;  %s154_s5 = sshll.u32 %s2148_s3, 4  ;;  %s142_s28 = int_to_ptr.vmem [resolvable:$true] %s141_s28  ;;  %s155_s5 = int_to_ptr.hbm [resolvable:$true] %s154_s5 }
  0x10   : > { %p1684_p3 = pnand %p1101_p0, %p128_p2  ;;  %s1621_s6 = smov [#allocation9]  }
  0x11   : > { %s156_s7 = sshll.u32 %s1621_s6, 4  ;;  %s1622_s8 = smov 128   ;;  %s157_s7 = int_to_ptr.vmem [resolvable:$true] %s156_s7 }
  0x12   : > { %p1202_p4 = pneg %p1684_p3  ;;  %s1623_s9 = smov 8  }
  0x13   : > { %s1100_s10 = sadd.s32 4294967294, %s1613_s22   ;;  %s1697_s11 = sadd.s32 1, %s1613_s22  }
  0x14   : > { %p1203_p5 = pnand %p1202_p4, %p50_p1  ;;  %s33_s12 = ssub.s32 %s1613_s22, %s1697_s11 }
  0x15   : > { %s36_s13 = sadd.s32 1, %s1609_s21  ;;  %p34_p6 = scmp.eq.s32.totalorder %s33_s12, 0 }
  0x16   : > { %1205 = dma.hbm_to_vmem [thread:$0]  (!%p1203_p5), %s140_s24, 8192, %s142_s28, [#allocation8], %s1622_s8, %s1622_s8, %s1623_s9  }
  0x17   : > { %1208 = dma.hbm_to_vmem [thread:$0]  (!%p1203_p5), %s155_s5, 128, %s157_s7, [#allocation8]  }
  0x18   : > { %p43_p7 = scmp.ne.s32.totalorder %s1609_s21, %s1605_s20  ;;  %p44_p8 = scmp.eq.s32.totalorder %s1613_s22, 0 }
  0x19   : > { %p49_p9 = scmp.ne.s32.totalorder %s1605_s20, %s1601_s19  ;;  %p115_p12 = scmp.eq.s32.totalorder %s1679_s25, 3 }
  0x1a   : > { %s1708_s14 = scalar_select %p34_p6, %s1609_s21, %s36_s13  }
  0x1b   : > { %p1710_p10 = por %p44_p8, %p43_p7  ;;  %p1716_p11 = por %p50_p1, %p49_p9 }
  0x1c   : > { %p121_p13 = scmp.eq.s32.totalorder %s1100_s10, 3  ;;  %p1219_p0 = scmp.lt.s32.totalorder %s1613_s22, 4 }
  0x1d   : > { %s167_s17 = sand.u32 1, %s1609_s21   ;;  %p1723_p2 = por %p115_p12, %p43_p7 }
  0x1e   : > { %p1727_p4 = por %p121_p13, %p49_p9  ;;  %s1105_s23 = sshll.u32 %s167_s17, 2 }
  0x1f   : > { %s1106_s24 = sshll.u32 %s1613_s22, 2  ;;  %s171_s30 = scalar_lea.vmem [#allocation4], %s1105_s23 }
  0x20   : > { %s175_s29 = scalar_lea.hbm %s2146_s1, %s1106_s24  ;;  %s179_s5 = sshll.u32 %s171_s30, 4  ;;  %s180_s5 = int_to_ptr.vmem [resolvable:$true] %s179_s5 }
  0x21   : > { %s177_s6 = sshll.u32 %s175_s29, 4  ;;  %p1737_p5 = pnand %p1219_p0, %p1710_p10  ;;  %s178_s6 = int_to_ptr.hbm [resolvable:$true] %s177_s6 }
  0x22   : > { %s168_s8 = scalar_lea.sflag [#allocation5], %s167_s17  ;;  %s1507_s9 = sshra.s32 %s178_s6, 4  ;;  %s1508_s9 = int_to_ptr.hbm [resolvable:$true] %s1507_s9 }
  0x23   : > { %s1509_s10 = scalar_lea.hbm %s1508_s9, 4  ;;  %p1511_p7 = pneg %p1737_p5 }
  0x24   : > { %p1510_p6 = scmp.ne.s32.totalorder %s1508_s9, %s1509_s10  ;;  %s1514_s23 = scalar_lea.hbm %s2146_s1, 16 }
  0x25   : > { %p1515_p10 = scmp.lt.s32.totalorder %s1508_s9, %s2146_s1  ;;  %p1516_p12 = scmp.lt.s32.totalorder %s1514_s23, %s1509_s10 }
  0x26   : > { %p1512_p8 = pnand %p1511_p7, %p1510_p6 }
  0x27   : > { %p1517_p13 = por %p1516_p12, %p1515_p10 }
  0x28   : > { %p1513_p9 = pneg %p1512_p8 }
  0x2a   : > { %p1518_p0 = pnand %p1517_p13, %p1513_p9 }
  0x2c   : > { %1521 = shalt.err (!%p1518_p0)
}
  0x2d   : > { %1212 = dma.hbm_to_vmem [thread:$0]  (!%p1737_p5), %s178_s6, 64, %s180_s5, %s168_s8  }
  0x2e   : > { %188 = sbr.rel (%p1684_p3) target bundleno = 692 (0x2b4), region = 32 }
  0x33   : > { %s1754_s17 = sand.u32 1, %s1605_s20  }
  0x34   : > { %s1108_s27 = sshll.u32 %s1754_s17, 2  ;;  %s191_s28 = scalar_lea.sflag [#allocation5], %s1754_s17 }
  0x35   : > { %s194_s29 = scalar_lea.vmem [#allocation4], %s1108_s27 }
  0x36   : > { %1588 = dma.done.wait (%p1716_p11), %s191_s28, 64  }
  0x37   : > { %1590 = vsyncadd (%p1716_p11), %s191_s28, 4294967232 }
  0x38   : > { %1592 = dma.done.wait (%p50_p1), [#allocation8], 8320  }
  0x39   : > { %1594 = vsyncadd (%p50_p1), [#allocation8], 4294958976  ;;  %v232_v0 = vlaneseq  ;;  %v231_v2 = vld [vmem:[%s194_s29] sm:$0xf]  ;;  %v1624_v7 = vmov 0.0   ;;  %v250_v14 = vld [vmem:[#allocation9] sm:$0xff] }
  0x3a   : > { %v236_v3 = vperm.slane %v231_v2, 2  ;;  %v237_v4 = vperm.slane %v231_v2, 3  ;;  %v234_v5 = vperm.slane %v231_v2, 0  ;;  %v235_v6 = vperm.slane %v231_v2, 1  ;;  %1188 = vmatpush.msra.mxu2 %v250_v14  ;;  %1189 = vmatpush.msra.mxu3 %v250_v14  ;;  %s1111_s26 = sshll.u32 %s1754_s17, 9  ;;  %s1112_s16 = sshll.u32 %s1679_s25, 9 }
  0x3b   : > { %v233_v1 = vshrl.u32 %v232_v0, 7  ;;  %587 = vmatpush.msra.mxu0 %v250_v14  ;;  %1187 = vmatpush.msra.mxu1 %v250_v14  ;;  %vm379_vm4 = vcmask 64512   ;;  %s1930_s30 = scalar_lea.vmem [#allocation10], %s1111_s26  ;;  %s1615_s5 = smov 0  }
  0x3d   : > { %vm240_vm0 = vcmp.eq.s32.totalorder %v233_v1, %v236_v3  ;;  %vm241_vm1 = vcmp.eq.s32.totalorder %v233_v1, %v237_v4  ;;  %vm238_vm2 = vcmp.eq.s32.totalorder %v233_v1, %v234_v5  ;;  %vm239_vm3 = vcmp.eq.s32.totalorder %v233_v1, %v235_v6 }
  0x3e   : > { %v1115_v8 = vsel %vm240_vm0, 1.0, %v1624_v7  ;;  %v1116_v9 = vsel %vm241_vm1, 1.0, %v1624_v7  ;;  %v1113_v10 = vsel %vm238_vm2, 1.0, %v1624_v7  ;;  %v1114_v11 = vsel %vm239_vm3, 1.0, %v1624_v7 }
  0x3f   : > { %v1271_v12 = vpack.i.bf16 %v1116_v9, %v1115_v8  ;;  %v1353_v13 = vpack.i.bf16 %v1114_v11, %v1113_v10 }
  0x41   : > { %1272 = vxpose.xlu0.b32.start.end [1/1] (short) %v1271_v12, 128 }
  0xc1   : > { %1354 = vxpose.xlu0.b32.start.end [1/1] (short) %v1353_v13, 128 }
  0xe5   : > { %v1273_v15 = vpop.trf.xlu0 }
  0xe6   : > { %v1274_v16 = vunpack.i.l.bf16 %v1273_v15  ;;  %v1277_v17 = vunpack.i.h.bf16 %v1273_v15 }
  0xe8   : > { %1149 = vmatmul.msk.f32.vlgmr.msra.gmra.mxu2 %vm379_vm4, %v1274_v16  ;;  %1165 = vmatmul.msk.f32.vlgmr.msra.gmra.mxu3 %vm379_vm4, %v1277_v17 }
  0xed   : > { %v1278_v18 = vpop.trf.xlu0 }
  0xee   : > { %v1279_v19 = vunpack.i.l.bf16 %v1278_v18  ;;  %v1282_v20 = vunpack.i.h.bf16 %v1278_v18 }
  0xf0   : > { %1150 = vmatmul.msk.f32.gmra.mxu2 %vm379_vm4, %v1279_v19  ;;  %1166 = vmatmul.msk.f32.gmra.mxu3 %vm379_vm4, %v1282_v20 }
  0xf5   : > { %v1283_v21 = vpop.trf.xlu0 }
  0xf6   : > { %v1284_v22 = vunpack.i.l.bf16 %v1283_v21  ;;  %v1287_v23 = vunpack.i.h.bf16 %v1283_v21 }
  0xf8   : > { %1151 = vmatmul.msk.f32.gmra.mxu2 %vm379_vm4, %v1284_v22  ;;  %1167 = vmatmul.msk.f32.gmra.mxu3 %vm379_vm4, %v1287_v23 }
  0xfd   : > { %v1288_v24 = vpop.trf.xlu0 }
  0xfe   : > { %v1289_v25 = vunpack.i.l.bf16 %v1288_v24  ;;  %v1292_v26 = vunpack.i.h.bf16 %v1288_v24 }
 0x100   : > { %1152 = vmatmul.msk.f32.gmra.mxu2 %vm379_vm4, %v1289_v25  ;;  %1168 = vmatmul.msk.f32.gmra.mxu3 %vm379_vm4, %v1292_v26 }
 0x105   : > { %v1293_v27 = vpop.trf.xlu0 }
 0x106   : > { %v1294_v28 = vunpack.i.l.bf16 %v1293_v27  ;;  %v1297_v29 = vunpack.i.h.bf16 %v1293_v27 }
 0x108   : > { %1153 = vmatmul.msk.f32.gmra.mxu2 %vm379_vm4, %v1294_v28  ;;  %1169 = vmatmul.msk.f32.gmra.mxu3 %vm379_vm4, %v1297_v29 }
 0x10d   : > { %v1298_v30 = vpop.trf.xlu0 }
 0x10e   : > { %v1299_v31 = vunpack.i.l.bf16 %v1298_v30  ;;  %v1302_v32 = vunpack.i.h.bf16 %v1298_v30 }
 0x110   : > { %1154 = vmatmul.msk.f32.gmra.mxu2 %vm379_vm4, %v1299_v31  ;;  %1170 = vmatmul.msk.f32.gmra.mxu3 %vm379_vm4, %v1302_v32 }
 0x115   : > { %v1303_v33 = vpop.trf.xlu0 }
 0x116   : > { %v1304_v34 = vunpack.i.l.bf16 %v1303_v33  ;;  %v1307_v35 = vunpack.i.h.bf16 %v1303_v33 }
 0x118   : > { %1155 = vmatmul.msk.f32.gmra.mxu2 %vm379_vm4, %v1304_v34  ;;  %1171 = vmatmul.msk.f32.gmra.mxu3 %vm379_vm4, %v1307_v35 }
 0x11d   : > { %v1308_v36 = vpop.trf.xlu0 }
 0x11e   : > { %v1309_v37 = vunpack.i.l.bf16 %v1308_v36  ;;  %v1312_v38 = vunpack.i.h.bf16 %v1308_v36 }
 0x120   : > { %1156 = vmatmul.msk.f32.gmra.mxu2 %vm379_vm4, %v1309_v37  ;;  %1172 = vmatmul.msk.f32.gmra.mxu3 %vm379_vm4, %v1312_v38 }
 0x125   : > { %v1313_v39 = vpop.trf.xlu0 }
 0x126   : > { %v1314_v40 = vunpack.i.l.bf16 %v1313_v39  ;;  %v1317_v41 = vunpack.i.h.bf16 %v1313_v39 }
 0x128   : > { %1157 = vmatmul.msk.f32.gmra.mxu2 %vm379_vm4, %v1314_v40  ;;  %1173 = vmatmul.msk.f32.gmra.mxu3 %vm379_vm4, %v1317_v41 }
 0x12d   : > { %v1318_v42 = vpop.trf.xlu0 }
 0x12e   : > { %v1319_v43 = vunpack.i.l.bf16 %v1318_v42  ;;  %v1322_v44 = vunpack.i.h.bf16 %v1318_v42 }
 0x130   : > { %1158 = vmatmul.msk.f32.gmra.mxu2 %vm379_vm4, %v1319_v43  ;;  %1174 = vmatmul.msk.f32.gmra.mxu3 %vm379_vm4, %v1322_v44 }
 0x135   : > { %v1323_v45 = vpop.trf.xlu0 }
 0x136   : > { %v1324_v46 = vunpack.i.l.bf16 %v1323_v45  ;;  %v1327_v47 = vunpack.i.h.bf16 %v1323_v45 }
 0x138   : > { %1159 = vmatmul.msk.f32.gmra.mxu2 %vm379_vm4, %v1324_v46  ;;  %1175 = vmatmul.msk.f32.gmra.mxu3 %vm379_vm4, %v1327_v47 }
 0x13d   : > { %v1328_v48 = vpop.trf.xlu0 }
 0x13e   : > { %v1329_v49 = vunpack.i.l.bf16 %v1328_v48  ;;  %v1332_v50 = vunpack.i.h.bf16 %v1328_v48 }
 0x140   : > { %1160 = vmatmul.msk.f32.gmra.mxu2 %vm379_vm4, %v1329_v49  ;;  %1176 = vmatmul.msk.f32.gmra.mxu3 %vm379_vm4, %v1332_v50 }
 0x145   : > { %v1333_v51 = vpop.trf.xlu0 }
 0x146   : > { %v1334_v52 = vunpack.i.l.bf16 %v1333_v51  ;;  %v1337_v53 = vunpack.i.h.bf16 %v1333_v51 }
 0x148   : > { %1161 = vmatmul.msk.f32.gmra.mxu2 %vm379_vm4, %v1334_v52  ;;  %1177 = vmatmul.msk.f32.gmra.mxu3 %vm379_vm4, %v1337_v53 }
 0x14d   : > { %v1338_v54 = vpop.trf.xlu0 }
 0x14e   : > { %v1339_v55 = vunpack.i.l.bf16 %v1338_v54  ;;  %v1342_v56 = vunpack.i.h.bf16 %v1338_v54 }
 0x150   : > { %1162 = vmatmul.msk.f32.gmra.mxu2 %vm379_vm4, %v1339_v55  ;;  %1178 = vmatmul.msk.f32.gmra.mxu3 %vm379_vm4, %v1342_v56 }
 0x155   : > { %v1343_v57 = vpop.trf.xlu0 }
 0x156   : > { %v1344_v58 = vunpack.i.l.bf16 %v1343_v57  ;;  %v1347_v59 = vunpack.i.h.bf16 %v1343_v57 }
 0x158   : > { %1163 = vmatmul.msk.f32.gmra.mxu2 %vm379_vm4, %v1344_v58  ;;  %1179 = vmatmul.msk.f32.gmra.mxu3 %vm379_vm4, %v1347_v59 }
 0x15d   : > { %v1348_v60 = vpop.trf.xlu0 }
 0x15e   : > { %v1349_v61 = vunpack.i.l.bf16 %v1348_v60  ;;  %v1352_v62 = vunpack.i.h.bf16 %v1348_v60 }
 0x160   : > { %1164 = vmatmul.msk.f32.gmra.mxu2 %vm379_vm4, %v1349_v61  ;;  %1180 = vmatmul.msk.f32.gmra.mxu3 %vm379_vm4, %v1352_v62 }
 0x165   : > { %v1355_v63 = vpop.trf.xlu0 }
 0x166   : > { %v1356_v0 = vunpack.i.l.bf16 %v1355_v63  ;;  %v1359_v1 = vunpack.i.h.bf16 %v1355_v63 }
 0x168   : > { %1117 = vmatmul.msk.f32.vlgmr.msra.gmra.mxu0 %vm379_vm4, %v1356_v0  ;;  %1133 = vmatmul.msk.f32.vlgmr.msra.gmra.mxu1 %vm379_vm4, %v1359_v1 }
 0x16b   : > { %v1802_v2 = vpop.f32.mrf.mxu2  ;;  %v1804_v3 = vpop.f32.mrf.mxu3 }
 0x16d   : > { %v1360_v4 = vpop.trf.xlu0 }
 0x16e   : > { %v1361_v5 = vunpack.i.l.bf16 %v1360_v4  ;;  %v1364_v6 = vunpack.i.h.bf16 %v1360_v4 }
 0x170   : > { %1118 = vmatmul.msk.f32.gmra.mxu0 %vm379_vm4, %v1361_v5  ;;  %1134 = vmatmul.msk.f32.gmra.mxu1 %vm379_vm4, %v1364_v6 }
 0x173   : > { %v1808_v7 = vpop.f32.mrf.mxu2  ;;  %v1810_v8 = vpop.f32.mrf.mxu3 }
 0x175   : > { %v1365_v9 = vpop.trf.xlu0 }
 0x176   : > { %v1366_v10 = vunpack.i.l.bf16 %v1365_v9  ;;  %v1369_v11 = vunpack.i.h.bf16 %v1365_v9 }
 0x178   : > { %1119 = vmatmul.msk.f32.gmra.mxu0 %vm379_vm4, %v1366_v10  ;;  %1135 = vmatmul.msk.f32.gmra.mxu1 %vm379_vm4, %v1369_v11 }
 0x17b   : > { %v1814_v12 = vpop.f32.mrf.mxu2  ;;  %v1816_v13 = vpop.f32.mrf.mxu3 }
 0x17d   : > { %v1370_v14 = vpop.trf.xlu0 }
 0x17e   : > { %v1371_v15 = vunpack.i.l.bf16 %v1370_v14  ;;  %v1374_v16 = vunpack.i.h.bf16 %v1370_v14 }
 0x180   : > { %1120 = vmatmul.msk.f32.gmra.mxu0 %vm379_vm4, %v1371_v15  ;;  %1136 = vmatmul.msk.f32.gmra.mxu1 %vm379_vm4, %v1374_v16 }
 0x183   : > { %v1820_v17 = vpop.f32.mrf.mxu2  ;;  %v1822_v18 = vpop.f32.mrf.mxu3 }
 0x184   : > { %2156 = vst [vmem:[#allocation15_spill] sm:$0xff] %v1822_v18 }
 0x185   : > { %v1375_v19 = vpop.trf.xlu0 }
 0x186   : > { %v1376_v20 = vunpack.i.l.bf16 %v1375_v19  ;;  %v1379_v21 = vunpack.i.h.bf16 %v1375_v19 }
 0x188   : > { %1121 = vmatmul.msk.f32.gmra.mxu0 %vm379_vm4, %v1376_v20  ;;  %1137 = vmatmul.msk.f32.gmra.mxu1 %vm379_vm4, %v1379_v21 }
 0x18b   : > { %v1826_v22 = vpop.f32.mrf.mxu2  ;;  %v1828_v23 = vpop.f32.mrf.mxu3 }
 0x18c   : > { %2157 = vst [vmem:[#allocation16_spill] sm:$0xff] %v1828_v23 }
 0x18d   : > { %v1380_v24 = vpop.trf.xlu0 }
 0x18e   : > { %v1381_v25 = vunpack.i.l.bf16 %v1380_v24  ;;  %v1384_v26 = vunpack.i.h.bf16 %v1380_v24 }
 0x190   : > { %1122 = vmatmul.msk.f32.gmra.mxu0 %vm379_vm4, %v1381_v25  ;;  %1138 = vmatmul.msk.f32.gmra.mxu1 %vm379_vm4, %v1384_v26 }
 0x193   : > { %v1832_v27 = vpop.f32.mrf.mxu2  ;;  %v1834_v28 = vpop.f32.mrf.mxu3 }
 0x194   : > { %2158 = vst [vmem:[#allocation17_spill] sm:$0xff] %v1834_v28 }
 0x195   : > { %v1385_v29 = vpop.trf.xlu0 }
 0x196   : > { %v1386_v30 = vunpack.i.l.bf16 %v1385_v29  ;;  %v1389_v31 = vunpack.i.h.bf16 %v1385_v29 }
 0x198   : > { %1123 = vmatmul.msk.f32.gmra.mxu0 %vm379_vm4, %v1386_v30  ;;  %1139 = vmatmul.msk.f32.gmra.mxu1 %vm379_vm4, %v1389_v31 }
 0x19b   : > { %v1838_v32 = vpop.f32.mrf.mxu2  ;;  %v1840_v33 = vpop.f32.mrf.mxu3 }
 0x19c   : > { %2159 = vst [vmem:[#allocation18_spill] sm:$0xff] %v1840_v33 }
 0x19d   : > { %v1390_v34 = vpop.trf.xlu0 }
 0x19e   : > { %v1391_v35 = vunpack.i.l.bf16 %v1390_v34  ;;  %v1394_v36 = vunpack.i.h.bf16 %v1390_v34 }
 0x1a0   : > { %1124 = vmatmul.msk.f32.gmra.mxu0 %vm379_vm4, %v1391_v35  ;;  %1140 = vmatmul.msk.f32.gmra.mxu1 %vm379_vm4, %v1394_v36 }
 0x1a3   : > { %v1844_v37 = vpop.f32.mrf.mxu2  ;;  %v1846_v38 = vpop.f32.mrf.mxu3 }
 0x1a4   : > { %2160 = vst [vmem:[#allocation19_spill] sm:$0xff] %v1846_v38 }
 0x1a5   : > { %v1395_v39 = vpop.trf.xlu0 }
 0x1a6   : > { %v1396_v40 = vunpack.i.l.bf16 %v1395_v39  ;;  %v1399_v41 = vunpack.i.h.bf16 %v1395_v39 }
 0x1a8   : > { %1125 = vmatmul.msk.f32.gmra.mxu0 %vm379_vm4, %v1396_v40  ;;  %1141 = vmatmul.msk.f32.gmra.mxu1 %vm379_vm4, %v1399_v41 }
 0x1ab   : > { %v1850_v42 = vpop.f32.mrf.mxu2  ;;  %v1852_v43 = vpop.f32.mrf.mxu3 }
 0x1ac   : > { %2161 = vst [vmem:[#allocation20_spill] sm:$0xff] %v1852_v43 }
 0x1ad   : > { %v1400_v44 = vpop.trf.xlu0 }
 0x1ae   : > { %v1401_v45 = vunpack.i.l.bf16 %v1400_v44  ;;  %v1404_v46 = vunpack.i.h.bf16 %v1400_v44 }
 0x1b0   : > { %1126 = vmatmul.msk.f32.gmra.mxu0 %vm379_vm4, %v1401_v45  ;;  %1142 = vmatmul.msk.f32.gmra.mxu1 %vm379_vm4, %v1404_v46 }
 0x1b3   : > { %v1856_v47 = vpop.f32.mrf.mxu2  ;;  %v1858_v48 = vpop.f32.mrf.mxu3 }
 0x1b4   : > { %2162 = vst [vmem:[#allocation21_spill] sm:$0xff] %v1858_v48 }
 0x1b5   : > { %v1405_v49 = vpop.trf.xlu0 }
 0x1b6   : > { %v1406_v50 = vunpack.i.l.bf16 %v1405_v49  ;;  %v1409_v51 = vunpack.i.h.bf16 %v1405_v49 }
 0x1b8   : > { %1127 = vmatmul.msk.f32.gmra.mxu0 %vm379_vm4, %v1406_v50  ;;  %1143 = vmatmul.msk.f32.gmra.mxu1 %vm379_vm4, %v1409_v51 }
 0x1bb   : > { %v1862_v52 = vpop.f32.mrf.mxu2  ;;  %v1864_v53 = vpop.f32.mrf.mxu3 }
 0x1bc   : > { %2163 = vst [vmem:[#allocation22_spill] sm:$0xff] %v1864_v53 }
 0x1bd   : > { %v1410_v54 = vpop.trf.xlu0 }
 0x1be   : > { %v1411_v55 = vunpack.i.l.bf16 %v1410_v54  ;;  %v1414_v56 = vunpack.i.h.bf16 %v1410_v54 }
 0x1c0   : > { %1128 = vmatmul.msk.f32.gmra.mxu0 %vm379_vm4, %v1411_v55  ;;  %1144 = vmatmul.msk.f32.gmra.mxu1 %vm379_vm4, %v1414_v56 }
 0x1c3   : > { %v1868_v57 = vpop.f32.mrf.mxu2  ;;  %v1870_v58 = vpop.f32.mrf.mxu3 }
 0x1c4   : > { %2164 = vst [vmem:[#allocation23_spill] sm:$0xff] %v1870_v58 }
 0x1c5   : > { %v1415_v59 = vpop.trf.xlu0 }
 0x1c6   : > { %v1416_v60 = vunpack.i.l.bf16 %v1415_v59  ;;  %v1419_v61 = vunpack.i.h.bf16 %v1415_v59 }
 0x1c8   : > { %1129 = vmatmul.msk.f32.gmra.mxu0 %vm379_vm4, %v1416_v60  ;;  %1145 = vmatmul.msk.f32.gmra.mxu1 %vm379_vm4, %v1419_v61 }
 0x1cb   : > { %v1874_v62 = vpop.f32.mrf.mxu2  ;;  %v1876_v63 = vpop.f32.mrf.mxu3 }
 0x1cc   : > { %2165 = vst [vmem:[#allocation24_spill] sm:$0xff] %v1876_v63 }
 0x1cd   : > { %v1420_v0 = vpop.trf.xlu0 }
 0x1ce   : > { %v1421_v1 = vunpack.i.l.bf16 %v1420_v0  ;;  %v1424_v4 = vunpack.i.h.bf16 %v1420_v0 }
 0x1d0   : > { %1130 = vmatmul.msk.f32.gmra.mxu0 %vm379_vm4, %v1421_v1  ;;  %1146 = vmatmul.msk.f32.gmra.mxu1 %vm379_vm4, %v1424_v4 }
 0x1d3   : > { %v1880_v5 = vpop.f32.mrf.mxu2  ;;  %v1882_v6 = vpop.f32.mrf.mxu3 }
 0x1d4   : > { %2166 = vst [vmem:[#allocation25_spill] sm:$0xff] %v1882_v6 }
 0x1d5   : > { %v1425_v9 = vpop.trf.xlu0 }
 0x1d6   : > { %v1426_v10 = vunpack.i.l.bf16 %v1425_v9  ;;  %v1429_v11 = vunpack.i.h.bf16 %v1425_v9 }
 0x1d8   : > { %1131 = vmatmul.msk.f32.gmra.mxu0 %vm379_vm4, %v1426_v10  ;;  %1147 = vmatmul.msk.f32.gmra.mxu1 %vm379_vm4, %v1429_v11 }
 0x1db   : > { %v1886_v14 = vpop.f32.mrf.mxu2  ;;  %v1888_v15 = vpop.f32.mrf.mxu3 }
 0x1dc   : > { %2167 = vst [vmem:[#allocation26_spill] sm:$0xff] %v1888_v15 }
 0x1dd   : > { %v1430_v16 = vpop.trf.xlu0 }
 0x1de   : > { %v1434_v19 = vunpack.i.h.bf16 %v1430_v16  ;;  %v1431_v20 = vunpack.i.l.bf16 %v1430_v16 }
 0x1e0   : > { %1132 = vmatmul.msk.f32.gmra.mxu0 %vm379_vm4, %v1431_v20  ;;  %1148 = vmatmul.msk.f32.gmra.mxu1 %vm379_vm4, %v1434_v19 }
 0x1e3   : > { %v1892_v21 = vpop.f32.mrf.mxu2  ;;  %v1894_v24 = vpop.f32.mrf.mxu3 }
 0x1e4   : > { %2168 = vst [vmem:[#allocation27_spill] sm:$0xff] %v1894_v24 }
 0x1e5   : > { %v589_v25 = vpop.f32.mrf.mxu0  ;;  %v1896_v26 = vpop.f32.mrf.mxu1 }
 0x1ed   : > { %v592_v29 = vpop.f32.mrf.mxu0  ;;  %v1898_v30 = vpop.f32.mrf.mxu1 }
 0x1f5   : > { %v595_v31 = vpop.f32.mrf.mxu0  ;;  %v1900_v34 = vpop.f32.mrf.mxu1 }
 0x1fd   : > { %v598_v35 = vpop.f32.mrf.mxu0  ;;  %v1902_v36 = vpop.f32.mrf.mxu1 }
 0x205   : > { %v601_v39 = vpop.f32.mrf.mxu0  ;;  %v1904_v40 = vpop.f32.mrf.mxu1 }
 0x20d   : > { %v604_v41 = vpop.f32.mrf.mxu0  ;;  %v1906_v44 = vpop.f32.mrf.mxu1 }
 0x215   : > { %v607_v45 = vpop.f32.mrf.mxu0  ;;  %v1908_v46 = vpop.f32.mrf.mxu1 }
 0x21d   : > { %v610_v49 = vpop.f32.mrf.mxu0  ;;  %v1910_v50 = vpop.f32.mrf.mxu1 }
 0x225   : > { %v613_v51 = vpop.f32.mrf.mxu0  ;;  %v1912_v54 = vpop.f32.mrf.mxu1 }
 0x22d   : > { %v616_v55 = vpop.f32.mrf.mxu0  ;;  %v1914_v56 = vpop.f32.mrf.mxu1 }
 0x235   : > { %v619_v59 = vpop.f32.mrf.mxu0  ;;  %v1916_v60 = vpop.f32.mrf.mxu1 }
 0x23d   : > { %v622_v61 = vpop.f32.mrf.mxu0  ;;  %v1918_v0 = vpop.f32.mrf.mxu1 }
 0x245   : > { %v625_v1 = vpop.f32.mrf.mxu0  ;;  %v1920_v4 = vpop.f32.mrf.mxu1 }
 0x24d   : > { %v628_v9 = vpop.f32.mrf.mxu0  ;;  %v1922_v10 = vpop.f32.mrf.mxu1 }
 0x255   : > { %v631_v11 = vpop.f32.mrf.mxu0  ;;  %v1924_v16 = vpop.f32.mrf.mxu1 }
 0x25d   : > { %v634_v19 = vpop.f32.mrf.mxu0  ;;  %v1926_v20 = vpop.f32.mrf.mxu1 }
 0x25e LB: >> { %s787_s6 = sadd.s32 %s1617_s5, %s1112_s16  ;;  %s791_s8 = scalar_lea.vmem %s1930_s30, %s1617_s5 [#allocation10]  ;;  %s1617_s5 = sphi %s1615_s5, %s786_s5  }
 0x25f   : >> { %s788_s7 = sld [smem:[#allocation3 + %s787_s6]]  ;;  %s786_s5 = sadd.s32 1, %s1617_s5  }
 0x260   : >> { %p783_p1 = scmp.ge.s32.totalorder %s786_s5, 512  }
 0x261   : > { %s997_s13 = scalar_lea.hbm (%p783_p1), %s2149_s4, %s1112_s16  ;;  %s998_s25 = sshll.u32 (%p783_p1), %s1930_s30, 4  ;;  %s999_s25 = int_to_ptr.vmem [resolvable:$true] %s998_s25 }
 0x262   : > { %s1000_s23 = sshll.u32 (%p783_p1), %s997_s13, 4  ;;  %s986_s24 = scalar_lea.sflag (%p783_p1), [#allocation6], %s1754_s17  ;;  %s1001_s23 = int_to_ptr.hbm [resolvable:$true] %s1000_s23 }
 0x263   : > { %785 = sbr.rel (!%p783_p1) target bundleno = 606 (0x25e), region = 94  ;;  %s1551_s15 = sshra.s32 (%p783_p1), %s1001_s23, 4  ;;  %s1552_s15 = int_to_ptr.hbm [resolvable:$true] %s1551_s15 }
 0x264   : > { %s1553_s27 = scalar_lea.hbm (%p783_p1), %s1552_s15, 512  ;;  %s1557_s26 = scalar_lea.hbm (%p783_p1), %s2149_s4, 2048 }
 0x265   : >> { %s789_s9 = scalar_lea.vmem [#allocation7], %s788_s7  ;;  %p1554_p3 = scmp.ne.s32.totalorder (%p783_p1), %s1552_s15, %s1553_s27 }
 0x266   : >> { %v790_v24 = vld [vmem:[%s789_s9] sm:$0x1]  ;;  %p1558_p6 = scmp.lt.s32.totalorder (%p783_p1), %s1552_s15, %s2149_s4  ;;  %p1559_p7 = scmp.lt.s32.totalorder (%p783_p1), %s1557_s26, %s1553_s27 }
 0x267   : >> { %792 = vst [vmem:[%s791_s8] sm:$0x1] %v790_v24  ;;  %p1555_p11 = pnand (%p783_p1), %p1554_p3, %p1723_p2 }
 0x268   : > { %p1560_p8 = por %p1559_p7, %p1558_p6 }
 0x269   : > { %p1556_p5 = pneg %p1555_p11 }
 0x26b   : > { %p1561_p9 = pnand %p1560_p8, %p1556_p5 }
 0x26e   : > { %v793_v15 = vld [vmem:[%s1930_s30] sm:$0xff]  ;;  %v794_v6 = vld [vmem:[%s1930_s30 + $0x8] sm:$0xff]  ;;  %v795_v63 = vld [vmem:[%s1930_s30 + $0x10] sm:$0xff] }
 0x26f   : > { %v857_v24 = vmul.f32 %v793_v15, %v589_v25  ;;  %v858_v58 = vmul.f32 %v794_v6, %v592_v29  ;;  %v859_v53 = vmul.f32 %v795_v63, %v595_v31  ;;  %v796_v48 = vld [vmem:[%s1930_s30 + $0x18] sm:$0xff]  ;;  %v797_v43 = vld [vmem:[%s1930_s30 + $0x20] sm:$0xff]  ;;  %v798_v38 = vld [vmem:[%s1930_s30 + $0x28] sm:$0xff] }
 0x270   : > { %v860_v33 = vmul.f32 %v796_v48, %v598_v35  ;;  %v799_v28 = vld [vmem:[%s1930_s30 + $0x30] sm:$0xff]  ;;  %v861_v23 = vmul.f32 %v797_v43, %v601_v39  ;;  %v800_v18 = vld [vmem:[%s1930_s30 + $0x38] sm:$0xff]  ;;  %v862_v15 = vmul.f32 %v798_v38, %v604_v41  ;;  %v801_v6 = vld [vmem:[%s1930_s30 + $0x40] sm:$0xff] }
 0x271   : > { %921 = vst [vmem:[%s1930_s30] sm:$0xff] %v857_v24  ;;  %v863_v63 = vmul.f32 %v799_v28, %v607_v45  ;;  %v802_v25 = vld [vmem:[%s1930_s30 + $0x48] sm:$0xff]  ;;  %v864_v48 = vmul.f32 %v800_v18, %v610_v49  ;;  %v803_v29 = vld [vmem:[%s1930_s30 + $0x50] sm:$0xff]  ;;  %v865_v43 = vmul.f32 %v801_v6, %v613_v51  ;;  %v804_v31 = vld [vmem:[%s1930_s30 + $0x58] sm:$0xff] }
 0x272   : > { %922 = vst [vmem:[%s1930_s30 + $0x8] sm:$0xff] %v858_v58  ;;  %v866_v38 = vmul.f32 %v802_v25, %v616_v55  ;;  %v805_v58 = vld [vmem:[%s1930_s30 + $0x60] sm:$0xff]  ;;  %v867_v28 = vmul.f32 %v803_v29, %v619_v59  ;;  %v868_v18 = vmul.f32 %v804_v31, %v622_v61  ;;  %v808_v35 = vld [vmem:[%s1930_s30 + $0x78] sm:$0xff]  ;;  %v810_v49 = vld [vmem:[%s1930_s30 + $0x88] sm:$0xff] }
 0x273   : > { %923 = vst [vmem:[%s1930_s30 + $0x10] sm:$0xff] %v859_v53  ;;  %v806_v53 = vld [vmem:[%s1930_s30 + $0x68] sm:$0xff]  ;;  %v809_v41 = vld [vmem:[%s1930_s30 + $0x80] sm:$0xff]  ;;  %v872_v51 = vmul.f32 %v808_v35, %v634_v19  ;;  %v811_v55 = vld [vmem:[%s1930_s30 + $0x90] sm:$0xff] }
 0x274   : > { %924 = vst [vmem:[%s1930_s30 + $0x18] sm:$0xff] %v860_v33  ;;  %v807_v33 = vld [vmem:[%s1930_s30 + $0x70] sm:$0xff]  ;;  %v870_v39 = vmul.f32 %v806_v53, %v628_v9  ;;  %v873_v59 = vmul.f32 %v809_v41, %v1896_v26  ;;  %v812_v61 = vld [vmem:[%s1930_s30 + $0x98] sm:$0xff]  ;;  %v813_v9 = vld [vmem:[%s1930_s30 + $0xa0] sm:$0xff] }
 0x275   : > { %925 = vst [vmem:[%s1930_s30 + $0x20] sm:$0xff] %v861_v23  ;;  %v869_v23 = vmul.f32 %v805_v58, %v625_v1  ;;  %v871_v45 = vmul.f32 %v807_v33, %v631_v11  ;;  %v874_v1 = vmul.f32 %v810_v49, %v1898_v30  ;;  %v875_v11 = vmul.f32 %v811_v55, %v1900_v34  ;;  %v814_v19 = vld [vmem:[%s1930_s30 + $0xa8] sm:$0xff]  ;;  %v815_v26 = vld [vmem:[%s1930_s30 + $0xb0] sm:$0xff]  ;;  %v816_v30 = vld [vmem:[%s1930_s30 + $0xb8] sm:$0xff] }
 0x276   : > { %926 = vst [vmem:[%s1930_s30 + $0x28] sm:$0xff] %v862_v15  ;;  %v876_v24 = vmul.f32 %v812_v61, %v1902_v36  ;;  %v877_v15 = vmul.f32 %v813_v9, %v1904_v40  ;;  %v878_v6 = vmul.f32 %v814_v19, %v1906_v44  ;;  %v817_v34 = vld [vmem:[%s1930_s30 + $0xc0] sm:$0xff]  ;;  %v818_v36 = vld [vmem:[%s1930_s30 + $0xc8] sm:$0xff]  ;;  %v880_v25 = vmul.f32 %v816_v30, %v1910_v50  ;;  %v819_v40 = vld [vmem:[%s1930_s30 + $0xd0] sm:$0xff] }
 0x277   : > { %927 = vst [vmem:[%s1930_s30 + $0x30] sm:$0xff] %v863_v63  ;;  %v879_v63 = vmul.f32 %v815_v26, %v1908_v46  ;;  %v820_v44 = vld [vmem:[%s1930_s30 + $0xd8] sm:$0xff]  ;;  %v882_v29 = vmul.f32 %v818_v36, %v1914_v56  ;;  %v821_v46 = vld [vmem:[%s1930_s30 + $0xe0] sm:$0xff]  ;;  %v822_v50 = vld [vmem:[%s1930_s30 + $0xe8] sm:$0xff] }
 0x278   : > { %928 = vst [vmem:[%s1930_s30 + $0x38] sm:$0xff] %v864_v48  ;;  %v881_v48 = vmul.f32 %v817_v34, %v1912_v54  ;;  %v884_v31 = vmul.f32 %v820_v44, %v1918_v0  ;;  %v823_v54 = vld [vmem:[%s1930_s30 + $0xf0] sm:$0xff]  ;;  %v824_v56 = vld [vmem:[%s1930_s30 + $0xf8] sm:$0xff]  ;;  %v886_v58 = vmul.f32 %v822_v50, %v1922_v10  ;;  %v826_v0 = vld [vmem:[%s1930_s30 + $0x108] sm:$0xff] }
 0x279   : > { %929 = vst [vmem:[%s1930_s30 + $0x40] sm:$0xff] %v865_v43  ;;  %v883_v43 = vmul.f32 %v819_v40, %v1916_v60  ;;  %v825_v60 = vld [vmem:[%s1930_s30 + $0x100] sm:$0xff]  ;;  %v888_v53 = vmul.f32 %v824_v56, %v1926_v20  ;;  %v828_v10 = vld [vmem:[%s1930_s30 + $0x118] sm:$0xff]  ;;  %v890_v33 = vmul.f32 %v826_v0, %v1808_v7  ;;  %v830_v20 = vld [vmem:[%s1930_s30 + $0x128] sm:$0xff] }
 0x27a   : > { %930 = vst [vmem:[%s1930_s30 + $0x48] sm:$0xff] %v866_v38  ;;  %v885_v38 = vmul.f32 %v821_v46, %v1920_v4  ;;  %v827_v4 = vld [vmem:[%s1930_s30 + $0x110] sm:$0xff]  ;;  %v892_v35 = vmul.f32 %v828_v10, %v1820_v17  ;;  %v832_v7 = vld [vmem:[%s1930_s30 + $0x138] sm:$0xff]  ;;  %v894_v41 = vmul.f32 %v830_v20, %v1832_v27  ;;  %v834_v17 = vld [vmem:[%s1930_s30 + $0x148] sm:$0xff] }
 0x27b   : > { %931 = vst [vmem:[%s1930_s30 + $0x50] sm:$0xff] %v867_v28  ;;  %v887_v28 = vmul.f32 %v823_v54, %v1924_v16  ;;  %v829_v16 = vld [vmem:[%s1930_s30 + $0x120] sm:$0xff]  ;;  %v896_v49 = vmul.f32 %v832_v7, %v1844_v37  ;;  %v836_v27 = vld [vmem:[%s1930_s30 + $0x158] sm:$0xff]  ;;  %v898_v55 = vmul.f32 %v834_v17, %v1856_v47  ;;  %v838_v37 = vld [vmem:[%s1930_s30 + $0x168] sm:$0xff] }
 0x27c   : > { %932 = vst [vmem:[%s1930_s30 + $0x58] sm:$0xff] %v868_v18  ;;  %v889_v18 = vmul.f32 %v825_v60, %v1802_v2  ;;  %v831_v2 = vld [vmem:[%s1930_s30 + $0x130] sm:$0xff]  ;;  %v900_v61 = vmul.f32 %v836_v27, %v1868_v57  ;;  %v840_v47 = vld [vmem:[%s1930_s30 + $0x178] sm:$0xff]  ;;  %v902_v9 = vmul.f32 %v838_v37, %v1880_v5  ;;  %v842_v57 = vld [vmem:[%s1930_s30 + $0x188] sm:$0xff] }
 0x27d   : > { %933 = vst [vmem:[%s1930_s30 + $0x60] sm:$0xff] %v869_v23  ;;  %v891_v23 = vmul.f32 %v827_v4, %v1814_v12  ;;  %v833_v12 = vld [vmem:[%s1930_s30 + $0x140] sm:$0xff]  ;;  %v904_v19 = vmul.f32 %v840_v47, %v1892_v21  ;;  %v844_v5 = vld [vmem:[%s1930_s30 + $0x198] sm:$0xff]  ;;  %v906_v26 = vmul.f32 %v842_v57, %v1810_v8  ;;  %v846_v21 = vld [vmem:[%s1930_s30 + $0x1a8] sm:$0xff] }
 0x27e   : > { %934 = vst [vmem:[%s1930_s30 + $0x68] sm:$0xff] %v870_v39  ;;  %v893_v39 = vmul.f32 %v829_v16, %v1826_v22  ;;  %v835_v22 = vld [vmem:[%s1930_s30 + $0x150] sm:$0xff]  ;;  %v2169_v30 = vld [vmem:[#allocation15_spill] sm:$0xff]  ;;  %v2170_v34 = vld [vmem:[#allocation16_spill] sm:$0xff] }
 0x27f   : > { %935 = vst [vmem:[%s1930_s30 + $0x70] sm:$0xff] %v871_v45  ;;  %v895_v45 = vmul.f32 %v831_v2, %v1838_v32  ;;  %v837_v32 = vld [vmem:[%s1930_s30 + $0x160] sm:$0xff]  ;;  %v848_v8 = vld [vmem:[%s1930_s30 + $0x1b8] sm:$0xff]  ;;  %v2171_v36 = vld [vmem:[#allocation17_spill] sm:$0xff] }
 0x280   : > { %936 = vst [vmem:[%s1930_s30 + $0x78] sm:$0xff] %v872_v51  ;;  %v897_v51 = vmul.f32 %v833_v12, %v1850_v42  ;;  %v839_v42 = vld [vmem:[%s1930_s30 + $0x170] sm:$0xff]  ;;  %v2172_v40 = vld [vmem:[#allocation18_spill] sm:$0xff]  ;;  %v850_v44 = vld [vmem:[%s1930_s30 + $0x1c8] sm:$0xff] }
 0x281   : > { %937 = vst [vmem:[%s1930_s30 + $0x80] sm:$0xff] %v873_v59  ;;  %v899_v59 = vmul.f32 %v835_v22, %v1862_v52  ;;  %v841_v52 = vld [vmem:[%s1930_s30 + $0x180] sm:$0xff]  ;;  %v2174_v50 = vld [vmem:[#allocation20_spill] sm:$0xff]  ;;  %v852_v54 = vld [vmem:[%s1930_s30 + $0x1d8] sm:$0xff] }
 0x282   : > { %938 = vst [vmem:[%s1930_s30 + $0x88] sm:$0xff] %v874_v1  ;;  %v901_v1 = vmul.f32 %v837_v32, %v1874_v62  ;;  %v843_v62 = vld [vmem:[%s1930_s30 + $0x190] sm:$0xff]  ;;  %v2176_v60 = vld [vmem:[#allocation22_spill] sm:$0xff]  ;;  %v854_v0 = vld [vmem:[%s1930_s30 + $0x1e8] sm:$0xff] }
 0x283   : > { %939 = vst [vmem:[%s1930_s30 + $0x90] sm:$0xff] %v875_v11  ;;  %v903_v11 = vmul.f32 %v839_v42, %v1886_v14  ;;  %v845_v14 = vld [vmem:[%s1930_s30 + $0x1a0] sm:$0xff]  ;;  %v2178_v10 = vld [vmem:[#allocation24_spill] sm:$0xff]  ;;  %v856_v16 = vld [vmem:[%s1930_s30 + $0x1f8] sm:$0xff] }
 0x284   : > { %940 = vst [vmem:[%s1930_s30 + $0x98] sm:$0xff] %v876_v24  ;;  %v905_v24 = vmul.f32 %v841_v52, %v1804_v3  ;;  %v847_v3 = vld [vmem:[%s1930_s30 + $0x1b0] sm:$0xff] }
 0x285   : > { %941 = vst [vmem:[%s1930_s30 + $0xa0] sm:$0xff] %v877_v15  ;;  %v907_v15 = vmul.f32 %v843_v62, %v1816_v13  ;;  %v849_v13 = vld [vmem:[%s1930_s30 + $0x1c0] sm:$0xff] }
 0x286   : > { %942 = vst [vmem:[%s1930_s30 + $0xa8] sm:$0xff] %v878_v6  ;;  %v908_v6 = vmul.f32 %v844_v5, %v2169_v30 }
 0x287   : > { %943 = vst [vmem:[%s1930_s30 + $0xb0] sm:$0xff] %v879_v63  ;;  %v909_v63 = vmul.f32 %v845_v14, %v2170_v34 }
 0x288   : > { %944 = vst [vmem:[%s1930_s30 + $0xb8] sm:$0xff] %v880_v25  ;;  %v910_v25 = vmul.f32 %v846_v21, %v2171_v36 }
 0x289   : > { %945 = vst [vmem:[%s1930_s30 + $0xc0] sm:$0xff] %v881_v48  ;;  %v911_v48 = vmul.f32 %v847_v3, %v2172_v40 }
 0x28a   : > { %946 = vst [vmem:[%s1930_s30 + $0xc8] sm:$0xff] %v882_v29  ;;  %v2173_v29 = vld [vmem:[#allocation19_spill] sm:$0xff] }
 0x28b   : > { %947 = vst [vmem:[%s1930_s30 + $0xd0] sm:$0xff] %v883_v43  ;;  %v912_v46 = vmul.f32 %v848_v8, %v2173_v29  ;;  %v851_v43 = vld [vmem:[%s1930_s30 + $0x1d0] sm:$0xff] }
 0x28c   : > { %948 = vst [vmem:[%s1930_s30 + $0xd8] sm:$0xff] %v884_v31  ;;  %v913_v31 = vmul.f32 %v849_v13, %v2174_v50 }
 0x28d   : > { %949 = vst [vmem:[%s1930_s30 + $0xe0] sm:$0xff] %v885_v38  ;;  %v2175_v38 = vld [vmem:[#allocation21_spill] sm:$0xff] }
 0x28e   : > { %950 = vst [vmem:[%s1930_s30 + $0xe8] sm:$0xff] %v886_v58  ;;  %v914_v56 = vmul.f32 %v850_v44, %v2175_v38  ;;  %v853_v58 = vld [vmem:[%s1930_s30 + $0x1e0] sm:$0xff] }
 0x28f   : > { %951 = vst [vmem:[%s1930_s30 + $0xf0] sm:$0xff] %v887_v28  ;;  %v915_v28 = vmul.f32 %v851_v43, %v2176_v60 }
 0x290   : > { %952 = vst [vmem:[%s1930_s30 + $0xf8] sm:$0xff] %v888_v53  ;;  %v2177_v53 = vld [vmem:[#allocation23_spill] sm:$0xff] }
 0x291   : > { %953 = vst [vmem:[%s1930_s30 + $0x100] sm:$0xff] %v889_v18  ;;  %v916_v4 = vmul.f32 %v852_v54, %v2177_v53  ;;  %v855_v18 = vld [vmem:[%s1930_s30 + $0x1f0] sm:$0xff] }
 0x292   : > { %954 = vst [vmem:[%s1930_s30 + $0x108] sm:$0xff] %v890_v33  ;;  %v917_v33 = vmul.f32 %v853_v58, %v2178_v10 }
 0x293   : > { %955 = vst [vmem:[%s1930_s30 + $0x110] sm:$0xff] %v891_v23  ;;  %v2179_v23 = vld [vmem:[#allocation25_spill] sm:$0xff] }
 0x294   : > { %956 = vst [vmem:[%s1930_s30 + $0x118] sm:$0xff] %v892_v35  ;;  %v918_v20 = vmul.f32 %v854_v0, %v2179_v23  ;;  %v2180_v35 = vld [vmem:[#allocation26_spill] sm:$0xff] }
 0x295   : > { %957 = vst [vmem:[%s1930_s30 + $0x120] sm:$0xff] %v893_v39  ;;  %v919_v2 = vmul.f32 %v855_v18, %v2180_v35  ;;  %v2181_v39 = vld [vmem:[#allocation27_spill] sm:$0xff] }
 0x296   : > { %958 = vst [vmem:[%s1930_s30 + $0x128] sm:$0xff] %v894_v41  ;;  %v920_v7 = vmul.f32 %v856_v16, %v2181_v39 }
 0x297   : > { %959 = vst [vmem:[%s1930_s30 + $0x130] sm:$0xff] %v895_v45 }
 0x298   : > { %960 = vst [vmem:[%s1930_s30 + $0x138] sm:$0xff] %v896_v49 }
 0x299   : > { %961 = vst [vmem:[%s1930_s30 + $0x140] sm:$0xff] %v897_v51 }
 0x29a   : > { %962 = vst [vmem:[%s1930_s30 + $0x148] sm:$0xff] %v898_v55 }
 0x29b   : > { %963 = vst [vmem:[%s1930_s30 + $0x150] sm:$0xff] %v899_v59 }
 0x29c   : > { %964 = vst [vmem:[%s1930_s30 + $0x158] sm:$0xff] %v900_v61 }
 0x29d   : > { %965 = vst [vmem:[%s1930_s30 + $0x160] sm:$0xff] %v901_v1 }
 0x29e   : > { %966 = vst [vmem:[%s1930_s30 + $0x168] sm:$0xff] %v902_v9 }
 0x29f   : > { %967 = vst [vmem:[%s1930_s30 + $0x170] sm:$0xff] %v903_v11 }
 0x2a0   : > { %968 = vst [vmem:[%s1930_s30 + $0x178] sm:$0xff] %v904_v19 }
 0x2a1   : > { %969 = vst [vmem:[%s1930_s30 + $0x180] sm:$0xff] %v905_v24 }
 0x2a2   : > { %970 = vst [vmem:[%s1930_s30 + $0x188] sm:$0xff] %v906_v26 }
 0x2a3   : > { %971 = vst [vmem:[%s1930_s30 + $0x190] sm:$0xff] %v907_v15 }
 0x2a4   : > { %972 = vst [vmem:[%s1930_s30 + $0x198] sm:$0xff] %v908_v6 }
 0x2a5   : > { %973 = vst [vmem:[%s1930_s30 + $0x1a0] sm:$0xff] %v909_v63 }
 0x2a6   : > { %974 = vst [vmem:[%s1930_s30 + $0x1a8] sm:$0xff] %v910_v25 }
 0x2a7   : > { %975 = vst [vmem:[%s1930_s30 + $0x1b0] sm:$0xff] %v911_v48 }
 0x2a8   : > { %976 = vst [vmem:[%s1930_s30 + $0x1b8] sm:$0xff] %v912_v46 }
 0x2a9   : > { %977 = vst [vmem:[%s1930_s30 + $0x1c0] sm:$0xff] %v913_v31 }
 0x2aa   : > { %978 = vst [vmem:[%s1930_s30 + $0x1c8] sm:$0xff] %v914_v56 }
 0x2ab   : > { %979 = vst [vmem:[%s1930_s30 + $0x1d0] sm:$0xff] %v915_v28 }
 0x2ac   : > { %980 = vst [vmem:[%s1930_s30 + $0x1d8] sm:$0xff] %v916_v4 }
 0x2ad   : > { %981 = vst [vmem:[%s1930_s30 + $0x1e0] sm:$0xff] %v917_v33 }
 0x2ae   : > { %982 = vst [vmem:[%s1930_s30 + $0x1e8] sm:$0xff] %v918_v20 }
 0x2af   : > { %983 = vst [vmem:[%s1930_s30 + $0x1f0] sm:$0xff] %v919_v2 }
 0x2b0   : > { %984 = vst [vmem:[%s1930_s30 + $0x1f8] sm:$0xff] %v920_v7 }
 0x2b1   : > { %1564 = shalt.err (!%p1561_p9)
}
 0x2b2   : > { %s1625_s17 = smov 128   ;;  %s1626_s30 = smov 8  }
 0x2b3   : > { %1200 = dma.vmem_to_hbm [thread:$0]  (%p1723_p2), %s999_s25, 8192, %s1001_s23, %s986_s24, %s1625_s17, %s1625_s17, %s1626_s30  }
 0x2b4 PF: > { %p1222_p10 = scmp.ge.s32.totalorder %s1613_s22, 2  ;;  %s1015_s6 = sand.u32 1, %s1601_s19  }
 0x2b5   : > { %s1016_s7 = scalar_lea.sflag [#allocation6], %s1015_s6 }
 0x2b6   : > { %p1214_p12 = pnand %p1222_p10, %p1727_p4 }
 0x2b8   : > { %p1215_p13 = pneg %p1214_p12 }
 0x2ba   : > { %1596 = dma.done.wait (%p1215_p13), %s1016_s7, 8192  }
 0x2bb   : > { %1598 = vsyncadd (%p1215_p13), %s1016_s7, 4294959104  ;;  %p26_p0 = scmp.ge.s32.totalorder %s1697_s11, 6   ;;  %s2182_s19 = smov %s1605_s20 }
 0x2bc   : > { %s2183_s20 = smov %s1609_s21  ;;  %s2184_s21 = smov %s1708_s14 }
 0x2bd   : > { %s2185_s22 = smov %s1697_s11  ;;  %28 = sbr.rel (!%p26_p0) target bundleno = 12 (0xc), region = 105 }
 0x2c2   :  { %1022 = vsyncpa [#allocation5], 1 }
 0x2c3   :  { %1024 = vsyncpa [#allocation5 + $0x1], 1 }
 0x2c4   :  { %1025 = vsyncpa [#allocation8], 1 }
 0x2c5   :  { %1026 = vsyncpa [#allocation6], 1 }
 0x2c6   :  { %1028 = vsyncpa [#allocation6 + $0x1], 1 }

</bundles_post_ra>
